<compile_context>
chip_gen: v7x
topology: tpu7x:2x2x1
jax: 0.10.0
libtpu: 0.0.40
codegen_flags: <defaults>
</compile_context>

<pallas_src>
import jax
import jax.numpy as jnp
from jax.experimental import pallas as pl
from jax.experimental.pallas import tpu as pltpu


def _trimodal_projection_kernel(xc_ref, xt_ref, xh_ref,
                                wc_ref, wt_ref, wh_ref, b_ref,
                                oc_ref, ot_ref, oh_ref):
    # One MXU matmul (f32 accumulation) + f32 VPU bias add + direct lane-dense
    # store per modality.  No concatenate / fused-slab copy in the epilogue.
    b = b_ref[...]  # (3, P) f32 stacked biases: [codex, text, HandE]

    yc = jnp.dot(xc_ref[...], wc_ref[...],
                 preferred_element_type=jnp.float32) + b[0:1, :]
    oc_ref[...] = yc.astype(oc_ref.dtype)

    yt = jnp.dot(xt_ref[...], wt_ref[...],
                 preferred_element_type=jnp.float32) + b[1:2, :]
    ot_ref[...] = yt.astype(ot_ref.dtype)

    yh = jnp.dot(xh_ref[...], wh_ref[...],
                 preferred_element_type=jnp.float32) + b[2:3, :]
    oh_ref[...] = yh.astype(oh_ref.dtype)


def trimodal_projection(xc, xt, xh, wc, wt, wh, b, *,
                        batch_tile=512,
                        compute_dtype=jnp.bfloat16,
                        vmem_limit_bytes=48 * 1024 * 1024):
    """Fused projection heads — three (B, P) outputs from one pallas_call.

    xc/xt/xh : (B, D_m) per-modality encoder features (D_m may differ).
    wc/wt/wh : (D_m, P) transposed nn.Linear weights (y = x @ W + b == torch).
    b        : (3, P) stacked biases, rows = [codex, text, HandE] (f32).
    Returns  : (codex_out, text_out, he_out), each (B, P).
    """
    B = xc.shape[0]
    P = wc.shape[-1]
    Dc, Dt, Dh = xc.shape[1], xt.shape[1], xh.shape[1]
    out_dtype = xc.dtype

    # HBM-bound at realistic dims -> halve operand traffic and use the MXU's
    # native bf16 path.  Accumulation / bias add / epilogue stay f32.
    if compute_dtype is not None:
        xc, xt, xh = (v.astype(compute_dtype) for v in (xc, xt, xh))
        wc, wt, wh = (v.astype(compute_dtype) for v in (wc, wt, wh))
    b = b.astype(jnp.float32)

    # Fixed batch tile; ragged last tile is handled (masked) by Pallas.  Never
    # fall back to tb=B for large B (no pipelining / no megacore split, and a
    # single huge tile can exceed v7x's 64 MiB VMEM).
    # Per-generation sweep: tb ~ 256-512 on v7x/v5e, 1024-2048 on v6e.
    if B <= batch_tile:
        tb = B                       # small batch: block == full array dims.
        grid = (1,)
    else:
        tb = batch_tile              # multiple of 8 (f32) / 16 (bf16).
        grid = (pl.cdiv(B, tb),)

    # Grid-invariant blocks (weights / biases) don't need double buffers.
    resident = {"pipeline_mode": pl.Buffered(1)} if grid[0] > 1 else {}

    grid_spec = pl.GridSpec(
        grid=grid,
        in_specs=[
            pl.BlockSpec((tb, Dc), lambda i: (i, 0)),              # codex feats
            pl.BlockSpec((tb, Dt), lambda i: (i, 0)),              # text feats
            pl.BlockSpec((tb, Dh), lambda i: (i, 0)),              # HandE feats
            pl.BlockSpec((Dc, P), lambda i: (0, 0), **resident),   # W codex
            pl.BlockSpec((Dt, P), lambda i: (0, 0), **resident),   # W text
            pl.BlockSpec((Dh, P), lambda i: (0, 0), **resident),   # W HandE
            pl.BlockSpec((3, P), lambda i: (0, 0), **resident),    # biases
        ],
        out_specs=[
            pl.BlockSpec((tb, P), lambda i: (i, 0)),               # codex out
            pl.BlockSpec((tb, P), lambda i: (i, 0)),               # text out
            pl.BlockSpec((tb, P), lambda i: (i, 0)),               # HandE out
        ],
    )

    return pl.pallas_call(
        _trimodal_projection_kernel,
        out_shape=(
            jax.ShapeDtypeStruct((B, P), out_dtype),
            jax.ShapeDtypeStruct((B, P), out_dtype),
            jax.ShapeDtypeStruct((B, P), out_dtype),
        ),
        grid_spec=grid_spec,
        compiler_params=pltpu.CompilerParams(
            # Batch tiles are independent -> shard across v7x's two TCs.
            dimension_semantics=("parallel",),
            vmem_limit_bytes=vmem_limit_bytes,
        ),
    )(xc, xt, xh, wc, wt, wh, b)


class TrimodalEncoderPallas:
    """Projection heads of TrimodalEncoder (shared_projection=False)."""

    def __init__(self, key, codex_dim=32, text_dim=32, he_dim=32,
                 projection_dim=16, dtype=jnp.float32,
                 compute_dtype=jnp.bfloat16):
        self.projection_dim = projection_dim
        self.compute_dtype = compute_dtype
        k_c, k_t, k_h = jax.random.split(key, 3)

        def xavier(k, d_in, d_out):
            # nn.init.xavier_uniform_: bound = sqrt(6 / (fan_in + fan_out)).
            bound = (6.0 / (d_in + d_out)) ** 0.5
            return jax.random.uniform(k, (d_in, d_out), dtype, -bound, bound)

        # Weights stored as (in_dim, out_dim); biases zero-init, stacked (3, P).
        self.w_codex = xavier(k_c, codex_dim, projection_dim)
        self.w_text = xavier(k_t, text_dim, projection_dim)
        self.w_he = xavier(k_h, he_dim, projection_dim)
        self.b = jnp.zeros((3, projection_dim), jnp.float32)

    def forward(self, data):
        # TODO(synk): BiomedBERT / CodexCNNTransformer / PLIP encoders are
        # external pretrained stacks; `data` carries their feature outputs
        # (unstacked — per-modality feature dims may differ).
        oc, ot, oh = trimodal_projection(
            data['codex'], data['text'], data['HandE'],
            self.w_codex, self.w_text, self.w_he, self.b,
            compute_dtype=self.compute_dtype)
        return {'codex': oc, 'text': ot, 'HandE': oh}


if __name__ == "__main__":
    key = jax.random.PRNGKey(0)
    B = 2
    codex_dim, text_dim, he_dim, P = 32, 64, 48, 16  # per-modality dims differ

    k_feat, k_params = jax.random.split(key)
    kc, kt, kh = jax.random.split(k_feat, 3)
    data = {
        'codex': jax.random.normal(kc, (B, codex_dim), jnp.float32),  # codex encoder out
        'text': jax.random.normal(kt, (B, text_dim), jnp.float32),    # text encoder out
        'HandE': jax.random.normal(kh, (B, he_dim), jnp.float32),     # PLIP encoder out
    }

    model = TrimodalEncoderPallas(k_params, codex_dim=codex_dim,
                                  text_dim=text_dim, he_dim=he_dim,
                                  projection_dim=P)
    out = model.forward(data)
    out = jax.block_until_ready(out)

    # Pure-JAX f32 reference of the projection math (kernel computes the dots
    # in bf16 with f32 accumulation -> small tolerance vs. the f32 reference).
    ref = {
        'codex': data['codex'] @ model.w_codex + model.b[0:1, :],
        'text': data['text'] @ model.w_text + model.b[1:2, :],
        'HandE': data['HandE'] @ model.w_he + model.b[2:3, :],
    }
    for name in ('codex', 'text', 'HandE'):
        assert out[name].shape == (B, P), name
        assert jnp.allclose(out[name], ref[name], rtol=5e-2, atol=5e-2), name

    print("KERNEL_OK")
</pallas_src>

<mosaic_0001>
module attributes {stable_mosaic.version = 11 : i64} {
  func.func @_trimodal_projection_kernel(%arg0: i32, %arg1: memref<2x32xbf16, #tpu.memory_space<vmem>>, %arg2: memref<2x64xbf16, #tpu.memory_space<vmem>>, %arg3: memref<2x48xbf16, #tpu.memory_space<vmem>>, %arg4: memref<32x16xbf16, #tpu.memory_space<vmem>>, %arg5: memref<64x16xbf16, #tpu.memory_space<vmem>>, %arg6: memref<48x16xbf16, #tpu.memory_space<vmem>>, %arg7: memref<3x16xf32, #tpu.memory_space<vmem>>, %arg8: memref<2x16xf32, #tpu.memory_space<vmem>>, %arg9: memref<2x16xf32, #tpu.memory_space<vmem>>, %arg10: memref<2x16xf32, #tpu.memory_space<vmem>>) attributes {dimension_semantics = [#tpu.dimension_semantics<parallel>], iteration_bounds = array<i64: 1>, scalar_prefetch = 0 : i64, scratch_operands = 0 : i64, tpu.core_type = #tpu.core_type<tc>, window_params = [{transform_indices = @transform_0, window_bounds = array<i64: 2, 32>}, {transform_indices = @transform_1, window_bounds = array<i64: 2, 64>}, {transform_indices = @transform_2, window_bounds = array<i64: 2, 48>}, {pipeline_mode = #tpu.pipeline_mode<synchronous>, transform_indices = @transform_3, window_bounds = array<i64: 32, 16>}, {pipeline_mode = #tpu.pipeline_mode<synchronous>, transform_indices = @transform_4, window_bounds = array<i64: 64, 16>}, {pipeline_mode = #tpu.pipeline_mode<synchronous>, transform_indices = @transform_5, window_bounds = array<i64: 48, 16>}, {pipeline_mode = #tpu.pipeline_mode<synchronous>, transform_indices = @transform_6, window_bounds = array<i64: 3, 16>}, {transform_indices = @transform_7, window_bounds = array<i64: 2, 16>}, {transform_indices = @transform_8, window_bounds = array<i64: 2, 16>}, {transform_indices = @transform_9, window_bounds = array<i64: 2, 16>}]} {
    %c0 = arith.constant 0 : index
    %c0_0 = arith.constant 0 : index
    %0 = vector.load %arg7[%c0, %c0_0] : memref<3x16xf32, #tpu.memory_space<vmem>>, vector<3x16xf32>
    %c0_1 = arith.constant 0 : index
    %c0_2 = arith.constant 0 : index
    %1 = vector.load %arg1[%c0_1, %c0_2] : memref<2x32xbf16, #tpu.memory_space<vmem>>, vector<2x32xbf16>
    %c0_3 = arith.constant 0 : index
    %c0_4 = arith.constant 0 : index
    %2 = vector.load %arg4[%c0_3, %c0_4] : memref<32x16xbf16, #tpu.memory_space<vmem>>, vector<32x16xbf16>
    %cst = arith.constant dense<0.000000e+00> : vector<2x16xf32>
    %3 = tpu.matmul %1, %2, %cst {dimension_numbers = #tpu.dot_dimension_numbers<[1], [0], [0], [1], [0, 0, 1, 1], [], []>} : vector<2x32xbf16>, vector<32x16xbf16>, vector<2x16xf32> -> vector<2x16xf32>
    %4 = vector.extract_strided_slice %0 {offsets = [0, 0], sizes = [1, 16], strides = [1, 1]} : vector<3x16xf32> to vector<1x16xf32>
    %5 = vector.broadcast %4 : vector<1x16xf32> to vector<2x16xf32>
    %6 = arith.addf %3, %5 : vector<2x16xf32>
    %c0_5 = arith.constant 0 : index
    %c0_6 = arith.constant 0 : index
    %7 = vector.load %arg8[%c0_5, %c0_6] : memref<2x16xf32, #tpu.memory_space<vmem>>, vector<2x16xf32>
    tpu.vector_store %arg8[%c0_5, %c0_6], %6 {strides = array<i32>} : memref<2x16xf32, #tpu.memory_space<vmem>>, vector<2x16xf32>,
    %c0_7 = arith.constant 0 : index
    %c0_8 = arith.constant 0 : index
    %8 = vector.load %arg2[%c0_7, %c0_8] : memref<2x64xbf16, #tpu.memory_space<vmem>>, vector<2x64xbf16>
    %c0_9 = arith.constant 0 : index
    %c0_10 = arith.constant 0 : index
    %9 = vector.load %arg5[%c0_9, %c0_10] : memref<64x16xbf16, #tpu.memory_space<vmem>>, vector<64x16xbf16>
    %cst_11 = arith.constant dense<0.000000e+00> : vector<2x16xf32>
    %10 = tpu.matmul %8, %9, %cst_11 {dimension_numbers = #tpu.dot_dimension_numbers<[1], [0], [0], [1], [0, 0, 1, 1], [], []>} : vector<2x64xbf16>, vector<64x16xbf16>, vector<2x16xf32> -> vector<2x16xf32>
    %11 = vector.extract_strided_slice %0 {offsets = [1, 0], sizes = [1, 16], strides = [1, 1]} : vector<3x16xf32> to vector<1x16xf32>
    %12 = vector.broadcast %11 : vector<1x16xf32> to vector<2x16xf32>
    %13 = arith.addf %10, %12 : vector<2x16xf32>
    %c0_12 = arith.constant 0 : index
    %c0_13 = arith.constant 0 : index
    %14 = vector.load %arg9[%c0_12, %c0_13] : memref<2x16xf32, #tpu.memory_space<vmem>>, vector<2x16xf32>
    tpu.vector_store %arg9[%c0_12, %c0_13], %13 {strides = array<i32>} : memref<2x16xf32, #tpu.memory_space<vmem>>, vector<2x16xf32>,
    %c0_14 = arith.constant 0 : index
    %c0_15 = arith.constant 0 : index
    %15 = vector.load %arg3[%c0_14, %c0_15] : memref<2x48xbf16, #tpu.memory_space<vmem>>, vector<2x48xbf16>
    %c0_16 = arith.constant 0 : index
    %c0_17 = arith.constant 0 : index
    %16 = vector.load %arg6[%c0_16, %c0_17] : memref<48x16xbf16, #tpu.memory_space<vmem>>, vector<48x16xbf16>
    %cst_18 = arith.constant dense<0.000000e+00> : vector<2x16xf32>
    %17 = tpu.matmul %15, %16, %cst_18 {dimension_numbers = #tpu.dot_dimension_numbers<[1], [0], [0], [1], [0, 0, 1, 1], [], []>} : vector<2x48xbf16>, vector<48x16xbf16>, vector<2x16xf32> -> vector<2x16xf32>
    %18 = vector.extract_strided_slice %0 {offsets = [2, 0], sizes = [1, 16], strides = [1, 1]} : vector<3x16xf32> to vector<1x16xf32>
    %19 = vector.broadcast %18 : vector<1x16xf32> to vector<2x16xf32>
    %20 = arith.addf %17, %19 : vector<2x16xf32>
    %c0_19 = arith.constant 0 : index
    %c0_20 = arith.constant 0 : index
    %21 = vector.load %arg10[%c0_19, %c0_20] : memref<2x16xf32, #tpu.memory_space<vmem>>, vector<2x16xf32>
    tpu.vector_store %arg10[%c0_19, %c0_20], %20 {strides = array<i32>} : memref<2x16xf32, #tpu.memory_space<vmem>>, vector<2x16xf32>,
    return
  }
  func.func @transform_0(%arg0: i32) -> (i32, i32) {
    %c0_i32 = arith.constant 0 : i32
    %c0_i32_0 = arith.constant 0 : i32
    return %arg0, %c0_i32 : i32, i32
  }
  func.func @transform_1(%arg0: i32) -> (i32, i32) {
    %c0_i32 = arith.constant 0 : i32
    %c0_i32_0 = arith.constant 0 : i32
    return %arg0, %c0_i32 : i32, i32
  }
  func.func @transform_2(%arg0: i32) -> (i32, i32) {
    %c0_i32 = arith.constant 0 : i32
    %c0_i32_0 = arith.constant 0 : i32
    return %arg0, %c0_i32 : i32, i32
  }
  func.func @transform_3(%arg0: i32) -> (i32, i32) {
    %c0_i32 = arith.constant 0 : i32
    %c0_i32_0 = arith.constant 0 : i32
    %c0_i32_1 = arith.constant 0 : i32
    return %c0_i32, %c0_i32_0 : i32, i32
  }
  func.func @transform_4(%arg0: i32) -> (i32, i32) {
    %c0_i32 = arith.constant 0 : i32
    %c0_i32_0 = arith.constant 0 : i32
    %c0_i32_1 = arith.constant 0 : i32
    return %c0_i32, %c0_i32_0 : i32, i32
  }
  func.func @transform_5(%arg0: i32) -> (i32, i32) {
    %c0_i32 = arith.constant 0 : i32
    %c0_i32_0 = arith.constant 0 : i32
    %c0_i32_1 = arith.constant 0 : i32
    return %c0_i32, %c0_i32_0 : i32, i32
  }
  func.func @transform_6(%arg0: i32) -> (i32, i32) {
    %c0_i32 = arith.constant 0 : i32
    %c0_i32_0 = arith.constant 0 : i32
    %c0_i32_1 = arith.constant 0 : i32
    return %c0_i32, %c0_i32_0 : i32, i32
  }
  func.func @transform_7(%arg0: i32) -> (i32, i32) {
    %c0_i32 = arith.constant 0 : i32
    %c0_i32_0 = arith.constant 0 : i32
    return %arg0, %c0_i32 : i32, i32
  }
  func.func @transform_8(%arg0: i32) -> (i32, i32) {
    %c0_i32 = arith.constant 0 : i32
    %c0_i32_0 = arith.constant 0 : i32
    return %arg0, %c0_i32 : i32, i32
  }
  func.func @transform_9(%arg0: i32) -> (i32, i32) {
    %c0_i32 = arith.constant 0 : i32
    %c0_i32_0 = arith.constant 0 : i32
    return %arg0, %c0_i32 : i32, i32
  }
}

</mosaic_0001>

<bundles_post_ra>
// kernel: tpu_custom_call.1
= control target key start
LH: loop header
LB: loop body
LE: loop exit
PB: predicated region body
PF: predicated region fallthrough
CT: control target
= control target key end

     0   :  { %15 = vsyncpa [#allocation3], 0  ;;  %v435_v1 = vmov 0.0   ;;  %vm436_vm0 = vmmov 0   ;;  %vm54_vm1 = vcmask 261120   ;;  %s578_s0 = inlined_call_operand.vmem [shape: bf16[2,32], index: 0, kind: input, shape index: {}]   ;;  %s579_s1 = inlined_call_operand.vmem [shape: bf16[2,64], index: 1, kind: input, shape index: {}]   ;;  %s580_s2 = inlined_call_operand.vmem [shape: bf16[2,48], index: 2, kind: input, shape index: {}]   ;;  %s581_s3 = inlined_call_operand.vmem [shape: bf16[32,16], index: 3, kind: input, shape index: {}]   ;;  %s582_s4 = inlined_call_operand.vmem [shape: bf16[64,16], index: 4, kind: input, shape index: {}]   ;;  %s583_s5 = inlined_call_operand.vmem [shape: bf16[48,16], index: 5, kind: input, shape index: {}]   ;;  %s584_s6 = inlined_call_operand.vmem [shape: f32[3,16], index: 6, kind: input, shape index: {}]   ;;  %s585_s7 = inlined_call_operand.hbm [shape: f32[2,16], index: 7, kind: output, shape index: {0}]   ;;  %s586_s8 = inlined_call_operand.hbm [shape: f32[2,16], index: 8, kind: output, shape index: {1}]   ;;  %s587_s9 = inlined_call_operand.hbm [shape: f32[2,16], index: 9, kind: output, shape index: {2}]  }
   0x1   :  { %v356_v0 = vld [vmem:[%s581_s3] sm:$0xff]   ;;  %321 = vmatprep.subr.bf16.mxu0 %v435_v1  ;;  %329 = vmatprep.subr.bf16.mxu1 %v435_v1  ;;  %v358_v3 = vld [vmem:[%s581_s3 + $0x8] sm:$0xff]   ;;  %v360_v7 = vld [vmem:[%s582_s4 + $0x10] sm:$0xff]  }
   0x2   :  { %v357_v2 = vld [vmem:[%s582_s4] sm:$0xff]   ;;  %322 = vmatpush3.bf16.msra.mxu0 %v356_v0  ;;  %325 = vmatprep.mubr.msk.bf16.mxu0 %vm436_vm0, %v435_v1  ;;  %v359_v4 = vld [vmem:[%s582_s4 + $0x8] sm:$0xff]  }
   0x3   :  { %330 = vmatpush3.bf16.msra.mxu1 %v357_v2  ;;  %323 = vmatprep.subr.bf16.mxu0 %v435_v1  ;;  %v33_v5 = vld [vmem:[%s578_s0] sm:$0x1]  ;;  %v363_v8 = vld [vmem:[%s583_s5 + $0x8] sm:$0xff]  }
   0x4   :  { %331 = vmatprep.subr.bf16.mxu1 %v435_v1  ;;  %337 = vmatprep.mubr.msk.bf16.mxu1 %vm436_vm0, %v435_v1  ;;  %v361_v6 = vld [vmem:[%s583_s5] sm:$0xff]  }
   0x6   :  { %324 = vmatpush3.bf16.msra.mxu0 %v358_v3 }
   0x7   :  { %332 = vmatpush3.bf16.msra.mxu1 %v359_v4  ;;  %341 = vmatprep.subr.bf16.mxu0 %v435_v1 }
   0x8   :  { %333 = vmatprep.subr.bf16.mxu1 %v435_v1 }
   0x9   :  { %326 = vmatmul.mubr.msk.bf16.vlgmr.msra.gmra.mrb[0].mxu0 %vm54_vm1, %v33_v5 }
   0xa   :  { %342 = vmatpush3.bf16.msra.mxu0 %v361_v6  ;;  %347 = vmatprep.mubr.msk.bf16.mxu0 %vm436_vm0, %v435_v1 }
   0xb   :  { %16 = vsyncpa [#allocation5], 0  ;;  %334 = vmatpush3.bf16.msra.mxu1 %v360_v7  ;;  %343 = vmatprep.subr.bf16.mxu0 %v435_v1  ;;  %v362_v9 = vld [vmem:[%s582_s4 + $0x18] sm:$0xff]   ;;  %v364_v10 = vld [vmem:[%s583_s5 + $0x10] sm:$0xff]   ;;  %vm137_vm2 = vcmask 523264   ;;  %vm211_vm3 = vcmask 392192   ;;  %v38_v13 = vlaneseq }
   0xc   :  { %335 = vmatprep.subr.bf16.mxu1 %v435_v1  ;;  %v100_v11 = vld [vmem:[%s579_s1] sm:$0x1]  ;;  %s437_s10 = smov [#allocation2]   ;;  %vm98_vm4 = vcmask 123904  }
   0xd   :  { %v182_v12 = vld [vmem:[%s580_s2] sm:$0x1]  ;;  %v39_v14 = vshrl.u32 %v38_v13, 7  ;;  %s262_s1 = sshll.u32 %s437_s10, 4  ;;  %s263_s1 = int_to_ptr.vmem [resolvable:$true] %s262_s1 }
   0xe   :  { %344 = vmatpush3.bf16.msra.mxu0 %v363_v8  ;;  %v32_v16 = vld [vmem:[%s584_s6] sm:$0x7]  ;;  %s365_s2 = scalar_lea.vmem %s263_s1, 32  ;;  %p370_p1 = scmp.lt.s32.totalorder %s263_s1, %s263_s1 }
   0xf   :  { %336 = vmatpush3.bf16.msra.mxu1 %v362_v9  ;;  %345 = vmatprep.subr.bf16.mxu0 %v435_v1  ;;  %v40_v15 = vsub.s32 0, %v39_v14  ;;  %v111_v22 = vsub.s32 1, %v39_v14  ;;  %p366_p0 = scmp.ne.s32.totalorder %s263_s1, %s365_s2  ;;  %p371_p2 = scmp.lt.s32.totalorder %s365_s2, %s365_s2 }
  0x11   :  { %v41_v17 = vrot.slane %v32_v16, %v40_v15  ;;  %p372_p3 = por %p371_p2, %p370_p1 }
  0x12   :  { %338 = vmatmul.mubr.msk.bf16.vlgmr.msra.gmra.mrb[0].mxu1 %vm137_vm2, %v100_v11  ;;  %346 = vmatpush3.bf16.msra.mxu0 %v364_v10 }
  0x13   :  { %p373_p4 = pnand %p372_p3, %p366_p0 }
  0x15   :  { %348 = vmatmul.mubr.msk.bf16.vlgmr.msra.gmra.mrb[4].mxu0 %vm211_vm3, %v182_v12 }
  0xdc   :  { %v92_v18 = vpop.f32.mrb[0].mxu0 }
  0xdd   :  { %v93_v19 = vadd.f32 %v92_v18, %v41_v17  ;;  %v327_v20 = vpop.f32.mrb[1].mxu0 }
  0xde   :  { %v95_v21 = vpop.f32.mrb[2].mxu0 }
  0xdf   :  { %v328_v23 = vpop.f32.mrb[3].mxu0  ;;  %99 = vst.msk [vmem:[#allocation2] sm:$0x3] %vm98_vm4, %v93_v19 }
  0xe0   :  { %376 = shalt.err (!%p373_p4)
}
  0xe1   :  { %s377_s12 = scalar_lea.hbm %s585_s7, 32 }
  0xe2   :  { %p378_p5 = scmp.ne.s32.totalorder %s585_s7, %s377_s12  ;;  %p381_p6 = scmp.lt.u32.totalorder %s377_s12, %s585_s7 }
  0xe4   :  { %p383_p7 = pnand %p381_p6, %p378_p5 }
  0xe6   :  { %386 = shalt.err (!%p383_p7)
}
  0xe7   :  { %265 = dma.vmem_to_hbm [thread:$0]  %s263_s1, 32, %s585_s7, [#allocation3]   ;;  %v191_v24 = vsub.s32 2, %v39_v14  ;;  %v112_v25 = vrot.slane %v32_v16, %v111_v22  ;;  %v175_v26 = vpop.f32.mrb[0].mxu1 }
  0xe8   :  { %s438_s19 = smov [#allocation4]   ;;  %s439_s20 = smov [#allocation6]   ;;  %v339_v29 = vpop.f32.mrb[1].mxu1  ;;  %v249_v32 = vpop.f32.mrb[4].mxu0 }
  0xe9   :  { %s272_s3 = sshll.u32 %s438_s19, 4  ;;  %v192_v27 = vrot.slane %v32_v16, %v191_v24  ;;  %s282_s21 = sshll.u32 %s439_s20, 4  ;;  %v176_v28 = vadd.f32 %v175_v26, %v112_v25  ;;  %v178_v30 = vpop.f32.mrb[2].mxu1  ;;  %v349_v34 = vpop.f32.mrb[5].mxu0  ;;  %s273_s3 = int_to_ptr.vmem [resolvable:$true] %s272_s3  ;;  %s546_s21 = int_to_ptr.vmem [resolvable:$true] %s282_s21 }
  0xea   :  { %v340_v31 = vpop.f32.mrb[3].mxu1  ;;  %s387_s7 = scalar_lea.vmem %s273_s3, 32  ;;  %p392_p9 = scmp.lt.s32.totalorder %s273_s3, %s273_s3 }
  0xeb   :  { %181 = vst.msk [vmem:[#allocation4] sm:$0x3] %vm98_vm4, %v176_v28  ;;  %v250_v33 = vadd.f32 %v249_v32, %v192_v27  ;;  %p388_p8 = scmp.ne.s32.totalorder %s273_s3, %s387_s7  ;;  %p393_p10 = scmp.lt.s32.totalorder %s387_s7, %s387_s7 }
  0xed   :  { %p394_p11 = por %p393_p10, %p392_p9 }
  0xef   :  { %p395_p12 = pnand %p394_p11, %p388_p8 }
  0xf1   :  { %398 = shalt.err (!%p395_p12)
}
  0xf2   :  { %s399_s0 = scalar_lea.hbm %s586_s8, 32 }
  0xf3   :  { %p400_p13 = scmp.ne.s32.totalorder %s586_s8, %s399_s0  ;;  %p403_p0 = scmp.lt.u32.totalorder %s399_s0, %s586_s8 }
  0xf5   :  { %p405_p1 = pnand %p403_p0, %p400_p13 }
  0xf7   :  { %408 = shalt.err (!%p405_p1)
}
  0xf8   :  { %275 = dma.vmem_to_hbm [thread:$0]  %s273_s3, 32, %s586_s8, [#allocation5]   ;;  %v252_v35 = vpop.f32.mrb[6].mxu0  ;;  %255 = vst.msk [vmem:[#allocation6] sm:$0x3] %vm98_vm4, %v250_v33 }
  0xf9   :  { %v350_v36 = vpop.f32.mrb[7].mxu0  ;;  %s409_s30 = scalar_lea.vmem %s546_s21, 32  ;;  %p414_p3 = scmp.lt.s32.totalorder %s546_s21, %s546_s21 }
  0xfa   :  { %p410_p2 = scmp.ne.s32.totalorder %s546_s21, %s409_s30  ;;  %p415_p4 = scmp.lt.s32.totalorder %s409_s30, %s409_s30 }
  0xfc   :  { %p416_p5 = por %p415_p4, %p414_p3 }
  0xfe   :  { %p417_p6 = pnand %p416_p5, %p410_p2 }
 0x100   :  { %420 = shalt.err (!%p417_p6)
}
 0x101   :  { %s421_s10 = scalar_lea.hbm %s587_s9, 32 }
 0x102   :  { %p422_p7 = scmp.ne.s32.totalorder %s587_s9, %s421_s10  ;;  %p425_p8 = scmp.lt.u32.totalorder %s421_s10, %s587_s9 }
 0x104   :  { %p427_p9 = pnand %p425_p8, %p422_p7 }
 0x106   :  { %430 = shalt.err (!%p427_p9)
}
 0x107   :  { %285 = dma.vmem_to_hbm [thread:$0]  %s546_s21, 32, %s587_s9, [#allocation5]  }
 0x108   :  { %431 = dma.done.wait [#allocation3], 32  }
 0x109   :  { %432 = vsyncadd [#allocation3], 4294967264 }
 0x10a   :  { %433 = dma.done.wait [#allocation5], 64  }
 0x10b   :  { %434 = vsyncadd [#allocation5], 4294967232 }
 0x10c   :  { %295 = vsyncpa [#allocation3], 1 }
 0x10d   :  { %296 = vsyncpa [#allocation5], 1 }

</bundles_post_ra>
